<compile_context>
chip_gen: v7x
topology: tpu7x:2x2x1
jax: 0.10.0
libtpu: 0.0.40
codegen_flags: <defaults>
</compile_context>

<pallas_src>
import functools

import jax
import jax.numpy as jnp
from jax import lax
from jax.experimental import pallas as pl
from jax.experimental.pallas import tpu as pltpu


def _ce_partial_sum_kernel(n_rows, logits_ref, tgt_ref, out_ref):
    """One grid step: CE over a (tm, C) row block; write the block partial sum lane-dense."""
    tm = logits_ref.shape[0]
    x = logits_ref[...].astype(jnp.float32)        # (tm, C); upcast after DMA (bf16 OK)
    t = tgt_ref[...]                               # (tm, 1) int32

    # Numerically stable logsumexp.  exp(x - m) is the only full-tile f32 temporary and
    # is consumed immediately by its lane reduction (keeps VMEM / vreg pressure low).
    m = jnp.max(x, axis=-1, keepdims=True)                                    # (tm, 1)
    lse = m + jnp.log(jnp.sum(jnp.exp(x - m), axis=-1, keepdims=True))        # (tm, 1)

    # ignore_index handling: targets < 0 -> -100 -> never matches any class column.
    # (Out-of-range labels t >= C silently give loss = lse; same as F.cross_entropy is
    # undefined there, documented and unchanged from the previous version.)
    masked_t = jnp.where(t < 0, -100, t)                                      # (tm, 1)
    col = lax.broadcasted_iota(jnp.int32, x.shape, 1)                         # (tm, C)
    x_tgt = jnp.sum(jnp.where(col == masked_t, x, 0.0),
                    axis=-1, keepdims=True)                                   # (tm, 1)

    loss = jnp.where(masked_t >= 0, lse - x_tgt, 0.0)                         # (tm, 1)

    # Ragged last block: rows past n_rows hold unspecified (possibly NaN/Inf) data from
    # the padded block DMA.  A select (not a multiply-by-mask) zeroes them and stops any
    # NaN propagation into the block partial sum.
    row = pl.program_id(0) * tm + lax.broadcasted_iota(jnp.int32, (tm, 1), 0)
    loss = jnp.where(row < n_rows, loss, 0.0)

    partial = jnp.sum(loss, axis=(0, 1), keepdims=True)                       # (1, 1)
    out_ref[...] = jnp.broadcast_to(partial, out_ref.shape)                   # (8,128) store


def _round_up(x: int, m: int) -> int:
    return (x + m - 1) // m * m


def _tile_and_vmem_limit(n: int, c: int, itemsize: int) -> tuple[int, int]:
    """Pick the row tile tm and the Mosaic VMEM limit per hardware generation."""
    try:
        vmem_cap = int(pltpu.get_tpu_info().vmem_capacity_bytes)
    except Exception:
        vmem_cap = 64 << 20  # assume the smallest (v7x per-TensorCore) if query fails

    c_vmem = _round_up(c, 128)  # lane-padded width of the (tm, C) tile in VMEM
    # VMEM bytes per tile row:
    #   2 x (tm, C)   : double-buffered logits input tile
    #   2 x 512 B     : double-buffered (tm, 1) int32 targets tile (lane-padded to 128)
    #   3 x (tm, C)f32: in-kernel temporaries (f32 upcast of x, exp(x-m), iota/select)
    per_row = 2 * c_vmem * itemsize + 2 * 512 + 3 * c_vmem * 4

    if vmem_cap >= (100 << 20):        # v5e / v6e: 128 MiB physical VMEM
        budget = 56 << 20              # total footprint budget (inputs + temporaries)
        vmem_limit = 96 << 20
    else:                              # v7x: 64 MiB per TensorCore (or unknown -> safe)
        budget = 28 << 20
        vmem_limit = 44 << 20

    tm = min(int(budget // per_row), 8192)
    tm = max(8, (tm // 8) * 8)
    tm = min(tm, _round_up(n, 8))      # never larger than the (8-rounded) batch
    return tm, vmem_limit


def cross_entropy_loss_mean(logits: jax.Array, targets: jax.Array, *,
                            tm: int | None = None) -> jax.Array:
    """CrossEntropyLoss (OOD-ignoring, reduction='mean') forward.

    logits: (N, C) float32 or bfloat16 (bf16 is passed straight to the kernel and
    upcast to f32 after the DMA -> half the HBM traffic).
    targets: (N,) int; negative values mean OOD / ignored (loss contribution 0, but the
    row still counts in the mean's divisor, matching pytorch_ood).
    """
    n, c = logits.shape
    itemsize = jnp.dtype(logits.dtype).itemsize

    auto_tm, vmem_limit = _tile_and_vmem_limit(n, c, itemsize)
    if tm is None:
        tm = auto_tm
    tm = max(8, (min(tm, _round_up(n, 8)) // 8) * 8)

    num_blocks = pl.cdiv(n, tm)

    # Targets as an (N, 1) int32 column; this is the only wrapper-side copy and it is
    # N*4 bytes (negligible).  The logits array is handed to pallas_call untouched.
    tgt2d = targets.astype(jnp.int32).reshape(n, 1)

    partials = pl.pallas_call(
        functools.partial(_ce_partial_sum_kernel, n),
        out_shape=jax.ShapeDtypeStruct((num_blocks * 8, 128), jnp.float32),
        grid_spec=pltpu.PrefetchScalarGridSpec(
            num_scalar_prefetch=0,
            grid=(num_blocks,),
            in_specs=[
                # Full (unpadded) class width: block last dim == array last dim is legal
                # even when C is not a multiple of 128, so no class padding is needed.
                pl.BlockSpec((tm, c), lambda i: (i, 0)),
                pl.BlockSpec((tm, 1), lambda i: (i, 0)),
            ],
            out_specs=pl.BlockSpec((8, 128), lambda i: (i, 0)),
        ),
        compiler_params=pltpu.CompilerParams(
            # Independent per-block partial sums -> both TensorCores usable on v7x;
            # harmless on v5e/v6e (single TC).
            dimension_semantics=("parallel",),
            vmem_limit_bytes=vmem_limit,
        ),
    )(logits, tgt2d)

    # Each block broadcast its partial sum over its (8, 128) tile; take one value per
    # block without a strided gather.
    total = jnp.sum(partials.reshape(num_blocks, 8, 128)[:, 0, 0])
    # Mean over ALL original rows (ignored/OOD rows contribute 0 but still count);
    # padded/ragged rows never reach the sum.
    return total / jnp.float32(n)


if __name__ == "__main__":
    key = jax.random.PRNGKey(0)
    k1, k2, k3 = jax.random.split(key, 3)

    def reference(lg, tg):
        cc = lg.shape[1]
        masked = jnp.where(tg < 0, -100, tg)
        logp = jax.nn.log_softmax(lg.astype(jnp.float32), axis=-1)
        per_row = -jnp.take_along_axis(
            logp, jnp.clip(masked, 0, cc - 1)[:, None], axis=-1)[:, 0]
        per_row = jnp.where(masked >= 0, per_row, 0.0)
        return per_row.mean()

    # Case 1: small lane-sparse C (block last dim == C < 128), some OOD labels.
    N, C = 16, 32
    logits = jax.random.normal(k1, (N, C), dtype=jnp.float32)
    targets = jax.random.randint(k2, (N,), 0, C, dtype=jnp.int32)
    ood_mask = jax.random.bernoulli(k3, 0.25, (N,))
    targets = jnp.where(ood_mask, -1, targets)

    loss = cross_entropy_loss_mean(logits, targets)
    jax.block_until_ready(loss)
    ref = reference(logits, targets)
    assert jnp.allclose(loss, ref, atol=1e-5, rtol=1e-4), (loss, ref)

    # Case 2: batch not a multiple of 8 and C not a multiple of 128 (exercises the
    # ragged last block masking and the unpadded class width).
    k4, k5, k6 = jax.random.split(k3, 3)
    N2, C2 = 50, 200
    logits2 = jax.random.normal(k4, (N2, C2), dtype=jnp.float32)
    targets2 = jax.random.randint(k5, (N2,), 0, C2, dtype=jnp.int32)
    targets2 = jnp.where(jax.random.bernoulli(k6, 0.3, (N2,)), -1, targets2)

    loss2 = cross_entropy_loss_mean(logits2, targets2)
    jax.block_until_ready(loss2)
    ref2 = reference(logits2, targets2)
    assert jnp.allclose(loss2, ref2, atol=1e-5, rtol=1e-4), (loss2, ref2)

    # Case 3: bf16 logits end-to-end (kernel upcasts after the DMA; reference uses the
    # same bf16 values upcast to f32, so results agree to f32 precision).
    k7, k8, k9 = jax.random.split(k6, 3)
    N3, C3 = 96, 384
    logits3 = jax.random.normal(k7, (N3, C3), dtype=jnp.float32).astype(jnp.bfloat16)
    targets3 = jax.random.randint(k8, (N3,), 0, C3, dtype=jnp.int32)
    targets3 = jnp.where(jax.random.bernoulli(k9, 0.2, (N3,)), -1, targets3)

    loss3 = cross_entropy_loss_mean(logits3, targets3)
    jax.block_until_ready(loss3)
    ref3 = reference(logits3, targets3)
    assert jnp.allclose(loss3, ref3, atol=1e-4, rtol=1e-4), (loss3, ref3)

    print("KERNEL_OK")
</pallas_src>

<mosaic_0001>
module attributes {stable_mosaic.version = 11 : i64} {
  func.func @_ce_partial_sum_kernel(%arg0: i32, %arg1: memref<16x32xf32, #tpu.memory_space<vmem>>, %arg2: memref<16x1xi32, #tpu.memory_space<vmem>>, %arg3: memref<8x128xf32, #tpu.memory_space<vmem>>) attributes {dimension_semantics = [#tpu.dimension_semantics<parallel>], iteration_bounds = array<i64: 1>, scalar_prefetch = 0 : i64, scratch_operands = 0 : i64, tpu.core_type = #tpu.core_type<tc>, window_params = [{transform_indices = @transform_0, window_bounds = array<i64: 16, 32>}, {transform_indices = @transform_1, window_bounds = array<i64: 16, 1>}, {transform_indices = @transform_2, window_bounds = array<i64: 8, 128>}]} {
    %c0 = arith.constant 0 : index
    %c0_0 = arith.constant 0 : index
    %0 = vector.load %arg1[%c0, %c0_0] : memref<16x32xf32, #tpu.memory_space<vmem>>, vector<16x32xf32>
    %c0_1 = arith.constant 0 : index
    %c0_2 = arith.constant 0 : index
    %1 = vector.load %arg2[%c0_1, %c0_2] : memref<16x1xi32, #tpu.memory_space<vmem>>, vector<16x1xi32>
    %cst = arith.constant dense<0xFF800000> : vector<16xf32>
    %2 = vector.multi_reduction <maximumf>, %0, %cst [1] : vector<16x32xf32> to vector<16xf32>
    %3 = vector.shape_cast %2 : vector<16xf32> to vector<16x1xf32>
    %4 = vector.broadcast %3 : vector<16x1xf32> to vector<16x32xf32>
    %5 = arith.subf %0, %4 : vector<16x32xf32>
    %6 = math.exp %5 : vector<16x32xf32>
    %cst_3 = arith.constant dense<0.000000e+00> : vector<16xf32>
    %7 = vector.multi_reduction <add>, %6, %cst_3 [1] : vector<16x32xf32> to vector<16xf32>
    %8 = vector.shape_cast %7 : vector<16xf32> to vector<16x1xf32>
    %9 = math.log %8 : vector<16x1xf32>
    %10 = arith.addf %3, %9 : vector<16x1xf32>
    %c0_i32 = arith.constant 0 : i32
    %11 = vector.broadcast %c0_i32 : i32 to vector<16x1xi32>
    %12 = arith.cmpi slt, %1, %11 : vector<16x1xi32>
    %c-100_i32 = arith.constant -100 : i32
    %13 = vector.broadcast %c-100_i32 : i32 to vector<16x1xi32>
    %14 = arith.select %12, %13, %1 : vector<16x1xi1>, vector<16x1xi32>
    %15 = tpu.iota {dimensions = array<i32: 1>} : vector<16x32xi32>
    %16 = vector.broadcast %14 : vector<16x1xi32> to vector<16x32xi32>
    %17 = arith.cmpi eq, %15, %16 : vector<16x32xi32>
    %cst_4 = arith.constant 0.000000e+00 : f32
    %18 = vector.broadcast %cst_4 : f32 to vector<16x32xf32>
    %19 = arith.select %17, %0, %18 : vector<16x32xi1>, vector<16x32xf32>
    %cst_5 = arith.constant dense<0.000000e+00> : vector<16xf32>
    %20 = vector.multi_reduction <add>, %19, %cst_5 [1] : vector<16x32xf32> to vector<16xf32>
    %21 = vector.shape_cast %20 : vector<16xf32> to vector<16x1xf32>
    %c0_i32_6 = arith.constant 0 : i32
    %22 = vector.broadcast %c0_i32_6 : i32 to vector<16x1xi32>
    %23 = arith.cmpi sge, %14, %22 : vector<16x1xi32>
    %24 = arith.subf %10, %21 : vector<16x1xf32>
    %cst_7 = arith.constant 0.000000e+00 : f32
    %25 = vector.broadcast %cst_7 : f32 to vector<16x1xf32>
    %26 = arith.select %23, %24, %25 : vector<16x1xi1>, vector<16x1xf32>
    %c16_i32 = arith.constant 16 : i32
    %27 = arith.muli %arg0, %c16_i32 : i32
    %28 = tpu.iota {dimensions = array<i32: 0>} : vector<16x1xi32>
    %29 = vector.broadcast %27 : i32 to vector<16x1xi32>
    %30 = arith.addi %29, %28 : vector<16x1xi32>
    %c16_i32_8 = arith.constant 16 : i32
    %31 = vector.broadcast %c16_i32_8 : i32 to vector<16x1xi32>
    %32 = arith.cmpi slt, %30, %31 : vector<16x1xi32>
    %cst_9 = arith.constant 0.000000e+00 : f32
    %33 = vector.broadcast %cst_9 : f32 to vector<16x1xf32>
    %34 = arith.select %32, %26, %33 : vector<16x1xi1>, vector<16x1xf32>
    %35 = vector.shape_cast %34 : vector<16x1xf32> to vector<1x16x1xf32>
    %cst_10 = arith.constant dense<0.000000e+00> : vector<1xf32>
    %36 = vector.multi_reduction <add>, %35, %cst_10 [1, 2] : vector<1x16x1xf32> to vector<1xf32>
    %37 = vector.shape_cast %36 : vector<1xf32> to vector<1x1x1xf32>
    %38 = vector.extract %37[0, 0, 0] : f32 from vector<1x1x1xf32>
    %39 = vector.broadcast %38 : f32 to vector<1x1xf32>
    %40 = vector.shape_cast %39 : vector<1x1xf32> to vector<1x1xf32>
    %41 = vector.broadcast %40 : vector<1x1xf32> to vector<8x128xf32>
    %c0_11 = arith.constant 0 : index
    %c0_12 = arith.constant 0 : index
    %42 = vector.load %arg3[%c0_11, %c0_12] : memref<8x128xf32, #tpu.memory_space<vmem>>, vector<8x128xf32>
    tpu.vector_store %arg3[%c0_11, %c0_12], %41 {strides = array<i32>} : memref<8x128xf32, #tpu.memory_space<vmem>>, vector<8x128xf32>,
    return
  }
  func.func @transform_0(%arg0: i32) -> (i32, i32) {
    %c0_i32 = arith.constant 0 : i32
    %c0_i32_0 = arith.constant 0 : i32
    return %arg0, %c0_i32 : i32, i32
  }
  func.func @transform_1(%arg0: i32) -> (i32, i32) {
    %c0_i32 = arith.constant 0 : i32
    %c0_i32_0 = arith.constant 0 : i32
    return %arg0, %c0_i32 : i32, i32
  }
  func.func @transform_2(%arg0: i32) -> (i32, i32) {
    %c0_i32 = arith.constant 0 : i32
    %c0_i32_0 = arith.constant 0 : i32
    return %arg0, %c0_i32 : i32, i32
  }
}

</mosaic_0001>

<bundles_post_ra>
// kernel: tpu_custom_call.1
= control target key start
LH: loop header
LB: loop body
LE: loop exit
PB: predicated region body
PF: predicated region fallthrough
CT: control target
= control target key end

     0   :  { %vm16_vm0 = vcmask 261120   ;;  %v147_v4 = vmov 0   ;;  %s194_s0 = inlined_call_operand.vmem [shape: f32[16,32], index: 0, kind: input, shape index: {}]   ;;  %s195_s1 = inlined_call_operand.vmem [shape: s32[16,1], index: 1, kind: input, shape index: {}]   ;;  %s196_s2 = inlined_call_operand.hbm [shape: f32[8,128], index: 2, kind: output, shape index: {}]  }
   0x1   :  { %v12_v0 = vld [vmem:[%s194_s0] sm:$0xff]  ;;  %v13_v1 = vld [vmem:[%s194_s0 + $0x8] sm:$0xff]  ;;  %113 = vset.pattern.permute.xlu1 %v147_v4  ;;  %114 = vset.pattern.permute.xlu0 %v147_v4 }
   0x2   :  { %v14_v2 = vld [vmem:[%s195_s1] sm:$0xff]  ;;  %v17_v3 = vsel %vm16_vm0, %v12_v0, -inf  ;;  %v15_v5 = vld [vmem:[%s195_s1 + $0x8] sm:$0xff] }
   0x3   :  { %vm41_vm1 = vcmp.lt.s32.totalorder %v14_v2, 0 }
   0x4   :  { %7 = vsyncpa [#allocation3], 0  ;;  %18 = vmax.xlane.f32.xlu0 %v17_v3  ;;  %v43_v6 = vsel %vm41_vm1, 4294967196, %v14_v2  ;;  %vm42_vm2 = vcmp.lt.s32.totalorder %v15_v5, 0  ;;  %v20_v7 = vsel %vm16_vm0, %v13_v1, -inf  ;;  %v45_v13 = vlaneseq  ;;  %s148_s0 = smov [#allocation2]  }
   0x5   :  { %48 = vperm.xlu1 %113, %v43_v6   ;;  %v44_v8 = vsel %vm42_vm2, 4294967196, %v15_v5  ;;  %vm63_vm5 = vcmp.ge.s32.totalorder %v43_v6, 0  ;;  %vm80_vm7 = vcmask 7168   ;;  %s101_s1 = sshll.u32 %s148_s0, 4  ;;  %s102_s1 = int_to_ptr.vmem [resolvable:$true] %s101_s1 }
   0x6   :  { %v46_v17 = vand.u32 127, %v45_v13  ;;  %vm64_vm6 = vcmp.ge.s32.totalorder %v44_v8, 0  ;;  %s123_s18 = scalar_lea.vmem %s102_s1, 128  ;;  %p128_p1 = scmp.lt.s32.totalorder %s102_s1, %s102_s1 }
   0x7   :  { %p124_p0 = scmp.ne.s32.totalorder %s102_s1, %s123_s18  ;;  %p129_p2 = scmp.lt.s32.totalorder %s123_s18, %s123_s18 }
   0x8   :  { %21 = vmax.xlane.f32.xlu0 %v20_v7 }
   0x9   :  { %51 = vperm.xlu1 %113, %v44_v8   ;;  %p130_p3 = por %p129_p2, %p128_p1 }
   0xb   :  { %p131_p4 = pnand %p130_p3, %p124_p0 }
  0x84   :  { %v49_v16 = vpop.permute.xlu1 %48 }
  0x85   :  { %vm53_vm3 = vcmp.eq.s32.totalorder %v46_v17, %v49_v16 }
  0x86   :  { %v55_v20 = vsel %vm53_vm3, %v12_v0, 0.0 }
  0x87   :  { %v57_v22 = vsel %vm16_vm0, %v55_v20, 0.0 }
  0x88   :  { %v52_v18 = vpop.permute.xlu1 %51 }
  0x89   :  { %vm54_vm4 = vcmp.eq.s32.totalorder %v46_v17, %v52_v18 }
  0x8a   :  { %v56_v24 = vsel %vm54_vm4, %v13_v1, 0.0 }
  0x8b   :  { %v60_v26 = vsel %vm16_vm0, %v56_v24, 0.0 }
  0x91   :  { %v19_v9 = vpop.xlane.xlu0 %18 }
  0x92   :  { %v23_v10 = vsub.f32 %v12_v0, %v19_v9 }
  0x94   :  { %v25_v11 = vmul.f32 1.442695, %v23_v10 }
  0x95   :  { %v22_v12 = vpop.xlane.xlu0 %21 }
  0x96   :  { %115 = vpow2.f32 %v25_v11  ;;  %v24_v14 = vsub.f32 %v13_v1, %v22_v12 }
  0x98   :  { %v27_v15 = vmul.f32 1.442695, %v24_v14 }
  0x9a   :  { %117 = vpow2.f32 %v27_v15 }
  0xa0   :  { %v116_v19 = vpop.eup %115 }
  0xa1   :  { %v29_v21 = vsel %vm16_vm0, %v116_v19, 0.0 }
  0xa2   :  { %30 = vadd.xlane.f32.xlu0 %v29_v21 }
  0xa4   :  { %v118_v23 = vpop.eup %117 }
  0xa5   :  { %v32_v25 = vsel %vm16_vm0, %v118_v23, 0.0 }
  0xa6   :  { %33 = vadd.xlane.f32.xlu1 %v32_v25  ;;  %58 = vadd.xlane.f32.xlu0 %v57_v22 }
  0xaa   :  { %61 = vadd.xlane.f32.xlu0 %v60_v26 }
 0x12f   :  { %v31_v27 = vpop.xlane.xlu0 %30 }
 0x130   :  { %119 = vlog2.f32 %v31_v27 }
 0x133   :  { %v34_v28 = vpop.xlane.xlu1 %33  ;;  %v59_v31 = vpop.xlane.xlu0 %58 }
 0x134   :  { %121 = vlog2.f32 %v34_v28 }
 0x137   :  { %v62_v37 = vpop.xlane.xlu0 %61 }
 0x13a   :  { %v120_v29 = vpop.eup %119 }
 0x13b   :  { %v36_v30 = vmul.f32 0.6931472, %v120_v29 }
 0x13d   :  { %v39_v32 = vadd.f32 %v36_v30, %v19_v9 }
 0x13e   :  { %v122_v33 = vpop.eup %121 }
 0x13f   :  { %v38_v34 = vmul.f32 0.6931472, %v122_v33  ;;  %v65_v35 = vsub.f32 %v39_v32, %v59_v31 }
 0x141   :  { %v40_v36 = vadd.f32 %v38_v34, %v22_v12  ;;  %v67_v38 = vsel %vm63_vm5, %v65_v35, 0.0 }
 0x142   :  { %v81_v41 = vsel %vm80_vm7, %v67_v38, 0.0 }
 0x143   :  { %v66_v39 = vsub.f32 %v40_v36, %v62_v37 }
 0x145   :  { %v68_v40 = vsel %vm64_vm6, %v66_v39, 0.0 }
 0x146   :  { %v82_v42 = vsel %vm80_vm7, %v68_v40, 0.0 }
 0x147   :  { %v83_v43 = vadd.f32 %v82_v42, %v81_v41 }
 0x149   :  { %84 = vadd.xlane.f32.xlu0 %v83_v43 }
 0x1d6   :  { %v85_v44 = vpop.xlane.xlu0 %84 }
 0x1d7   :  { %v86_v45 = vrot.slane %v85_v44, 4 }
 0x1d9   :  { %v87_v46 = vadd.f32 %v86_v45, %v85_v44 }
 0x1db   :  { %v88_v47 = vrot.slane %v87_v46, 2 }
 0x1dd   :  { %v89_v48 = vadd.f32 %v88_v47, %v87_v46 }
 0x1df   :  { %v90_v49 = vrot.slane %v89_v48, 1 }
 0x1e1   :  { %v91_v50 = vadd.f32 %v90_v49, %v89_v48 }
 0x1e3   :  { %109 = vpush %v91_v50 }
 0x214   :  { %s110_s17 = spop %109 }
 0x215   :  { %v93_v51 = vstv %s110_s17 }
 0x216   :  { %94 = vst [vmem:[#allocation2] sm:$0xff] %v93_v51 }
 0x217   :  { %134 = shalt.err (!%p131_p4)
}
 0x218   :  { %s135_s21 = scalar_lea.hbm %s196_s2, 128 }
 0x219   :  { %p136_p5 = scmp.ne.s32.totalorder %s196_s2, %s135_s21  ;;  %p139_p6 = scmp.lt.u32.totalorder %s135_s21, %s196_s2 }
 0x21b   :  { %p141_p7 = pnand %p139_p6, %p136_p5 }
 0x21d   :  { %144 = shalt.err (!%p141_p7)
}
 0x21e   :  { %104 = dma.vmem_to_hbm [thread:$0]  %s102_s1, 128, %s196_s2, [#allocation3]  }
 0x21f   :  { %145 = dma.done.wait [#allocation3], 128  }
 0x220   :  { %146 = vsyncadd [#allocation3], 4294967168 }
 0x221   :  { %108 = vsyncpa [#allocation3], 1 }

</bundles_post_ra>
